<compile_context>
chip_gen: v7x
topology: tpu7x:2x2x1
jax: 0.10.0
libtpu: 0.0.40
codegen_flags: <defaults>
</compile_context>

<pallas_src>
import math

import jax
import jax.numpy as jnp
from jax import lax
from jax.experimental import pallas as pl
from jax.experimental.pallas import tpu as pltpu


# ---------------------------------------------------------------------------
# Kernel factory: fused QKV + per-head attention + output projection for one
# batch element per grid step. Signature adapts to (mask present?, attn out?).
# ---------------------------------------------------------------------------
def _make_mha_kernel(num_heads, head_dim, scale, with_mask, with_attn, out_dtype):
    hd = num_heads * head_dim

    def kernel(*refs):
        i = 0
        x_ref = refs[i]; i += 1
        mask_ref = None
        if with_mask:
            mask_ref = refs[i]; i += 1
        wqkv_ref = refs[i]; i += 1
        wproj_ref = refs[i]; i += 1
        bias_ref = refs[i]; i += 1
        out_ref = refs[i]; i += 1
        attn_ref = refs[i] if with_attn else None

        # Fused wide-N QKV projection: bf16 operands, f32 accumulation (MXU).
        x = x_ref[0].astype(jnp.bfloat16)                       # (S, E)
        qkv = jnp.dot(x, wqkv_ref[...],
                      preferred_element_type=jnp.float32)       # (S, 3*H*D) f32

        q_all = (qkv[:, :hd] * scale).astype(jnp.bfloat16)      # scale folded into q
        k_all = qkv[:, hd:2 * hd].astype(jnp.bfloat16)
        v_all = qkv[:, 2 * hd:].astype(jnp.bfloat16)

        if with_mask:
            masked = mask_ref[0] == 0                           # (S, S) bool

        head_outs = []
        for h in range(num_heads):
            lo, hi = h * head_dim, (h + 1) * head_dim
            qh = q_all[:, lo:hi]                                # (S, D)
            kh = k_all[:, lo:hi]
            vh = v_all[:, lo:hi]

            # scores = q @ k^T without materializing a transposed copy.
            s = lax.dot_general(qh, kh, (((1,), (1,)), ((), ())),
                                preferred_element_type=jnp.float32)   # (S, S)
            if with_mask:
                s = jnp.where(masked, -jnp.inf, s)

            # softmax over last dim (f32 math), divide moved to the EUP.
            m = jnp.max(s, axis=-1, keepdims=True)
            e = jnp.exp(s - m)
            denom = jnp.sum(e, axis=-1, keepdims=True)
            p = e * pl.reciprocal(denom, approx=True)

            if with_attn:
                attn_ref[0, h] = p.astype(attn_ref.dtype)

            head_outs.append(jnp.dot(p.astype(jnp.bfloat16), vh,
                                     preferred_element_type=jnp.float32))

        # Concat heads lane-dense and apply the output Linear in the same step
        # (no intermediate (B, S, H*D) HBM round trip).
        hidden = jnp.concatenate(head_outs, axis=-1).astype(jnp.bfloat16)  # (S, H*D)
        y = jnp.dot(hidden, wproj_ref[...],
                    preferred_element_type=jnp.float32) + bias_ref[...]
        out_ref[0] = y.astype(out_dtype)

    return kernel


# ---------------------------------------------------------------------------
# Wrapper
# ---------------------------------------------------------------------------
def multi_head_attention(inputs, attention_mask, wq, wk, wv, w_proj, b_proj,
                         *, output_attentions=False):
    """
    inputs:         (B, S, E) float32
    attention_mask: (B, S, S) or None; positions where mask == 0 get -inf
    wq, wk, wv:     (H, E, D) stacked per-head weights (AttentionHead.Q/K/V)
    w_proj:         (H*D, E) so hidden @ w_proj matches nn.Linear(H*D, E)
    b_proj:         (E,)
    returns: (hidden_states (B, S, E), attentions (B, H, S, S) or None)
    """
    B, S, E = inputs.shape
    H, _, D = wq.shape
    HD = H * D
    scale = 1.0 / math.sqrt(D)
    with_mask = attention_mask is not None

    # Pack per-head weights into one wide-N (E, 3*H*D) bf16 matrix so the QKV
    # projection is a single lane-dense MXU matmul (done once per call; in a
    # real model these would be stored pre-packed).
    def _flat(w):  # (H, E, D) -> (E, H*D)
        return jnp.transpose(w, (1, 0, 2)).reshape(E, HD)

    wqkv = jnp.concatenate([_flat(wq), _flat(wk), _flat(wv)],
                           axis=-1).astype(jnp.bfloat16)        # (E, 3*H*D)
    wproj = w_proj.astype(jnp.bfloat16)                          # (H*D, E)
    bias2d = b_proj.reshape(1, E).astype(jnp.float32)

    kernel = _make_mha_kernel(H, D, scale, with_mask, output_attentions,
                              inputs.dtype)

    in_specs = [pl.BlockSpec((1, S, E), lambda b: (b, 0, 0))]    # x
    args = [inputs]
    if with_mask:
        in_specs.append(pl.BlockSpec((1, S, S), lambda b: (b, 0, 0)))
        args.append(attention_mask)
    in_specs += [
        pl.BlockSpec((E, 3 * HD), lambda b: (0, 0)),             # Wqkv (resident)
        pl.BlockSpec((HD, E), lambda b: (0, 0)),                 # Wproj (resident)
        pl.BlockSpec((1, E), lambda b: (0, 0)),                  # bias  (resident)
    ]
    args += [wqkv, wproj, bias2d]

    out_spec = pl.BlockSpec((1, S, E), lambda b: (b, 0, 0))
    if output_attentions:
        out_shape = (jax.ShapeDtypeStruct((B, S, E), inputs.dtype),
                     jax.ShapeDtypeStruct((B, H, S, S), jnp.float32))
        out_specs = (out_spec,
                     pl.BlockSpec((1, H, S, S), lambda b: (b, 0, 0, 0)))
    else:
        out_shape = jax.ShapeDtypeStruct((B, S, E), inputs.dtype)
        out_specs = out_spec

    # Explicit VMEM budget: double-buffered pipeline blocks + rough working set.
    est = 2 * (S * E * 4 + (S * S * 4 if with_mask else 0)
               + E * 3 * HD * 2 + HD * E * 2 + E * 4 + S * E * 4
               + (H * S * S * 4 if output_attentions else 0))
    est += S * 3 * HD * 4 + 2 * S * S * 4 + S * HD * 4
    vmem_limit = int(min(128 * 2 ** 20, max(32 * 2 ** 20, 2 * est)))

    result = pl.pallas_call(
        kernel,
        out_shape=out_shape,
        grid=(B,),
        in_specs=in_specs,
        out_specs=out_specs,
        compiler_params=pltpu.CompilerParams(
            dimension_semantics=("parallel",),    # batch shards across TCs (v7x)
            vmem_limit_bytes=vmem_limit),
    )(*args)

    if output_attentions:
        out, attn = result
        return out, attn
    return result, None


# ---------------------------------------------------------------------------
# Pure-JAX reference (mirrors the PyTorch forward, eval mode)
# ---------------------------------------------------------------------------
def _reference(inputs, attention_mask, wq, wk, wv, w_proj, b_proj):
    H, _, D = wq.shape
    scale = 1.0 / math.sqrt(D)
    q = jnp.einsum("bse,hed->bhsd", inputs, wq)
    k = jnp.einsum("bse,hed->bhsd", inputs, wk)
    v = jnp.einsum("bse,hed->bhsd", inputs, wv)
    w = jnp.einsum("bhsd,bhtd->bhst", q, k) * scale
    if attention_mask is not None:
        w = jnp.where(attention_mask[:, None, :, :] == 0, -jnp.inf, w)
    p = jax.nn.softmax(w, axis=-1)
    states = jnp.einsum("bhst,bhtd->bhsd", p, v)
    B, S = inputs.shape[0], inputs.shape[1]
    hidden = jnp.transpose(states, (0, 2, 1, 3)).reshape(B, S, H * D)
    return hidden @ w_proj + b_proj, p


if __name__ == "__main__":
    B, S, E, H, D = 2, 8, 32, 4, 16

    key = jax.random.PRNGKey(0)
    k_x, k_q, k_k, k_v, k_w, k_b = jax.random.split(key, 6)

    inputs = jax.random.normal(k_x, (B, S, E), dtype=jnp.float32)
    wq = jax.random.normal(k_q, (H, E, D), dtype=jnp.float32) * 0.01
    wk = jax.random.normal(k_k, (H, E, D), dtype=jnp.float32) * 0.01
    wv = jax.random.normal(k_v, (H, E, D), dtype=jnp.float32) * 0.01
    # nn.Linear(num_heads*head_dim, embedding_dim): weight (E, H*D), bias (E,)
    lim = 1.0 / math.sqrt(H * D)
    w_lin = jax.random.uniform(k_w, (E, H * D), minval=-lim, maxval=lim,
                               dtype=jnp.float32)
    b_proj = jax.random.uniform(k_b, (E,), minval=-lim, maxval=lim,
                                dtype=jnp.float32)
    w_proj = w_lin.T  # (H*D, E): hidden @ w_proj == x @ W^T of nn.Linear

    # causal attention mask (B, S, S): 0 -> masked
    mask = jnp.broadcast_to(
        jnp.tril(jnp.ones((S, S), dtype=jnp.int32)), (B, S, S))

    # Path 1: with attention probabilities.
    out, attn = multi_head_attention(inputs, mask, wq, wk, wv, w_proj, b_proj,
                                     output_attentions=True)
    out = jax.block_until_ready(out)
    attn = jax.block_until_ready(attn)

    # Path 2: attention output gated out at compile time.
    out_noattn, none_attn = multi_head_attention(
        inputs, mask, wq, wk, wv, w_proj, b_proj, output_attentions=False)
    out_noattn = jax.block_until_ready(out_noattn)

    ref_out, ref_attn = _reference(inputs, mask, wq, wk, wv, w_proj, b_proj)

    assert out.shape == (B, S, E)
    assert attn.shape == (B, H, S, S)
    assert none_attn is None
    # bf16 MXU operands -> relaxed tolerance vs. the f32 reference.
    assert jnp.allclose(out, ref_out, atol=2e-2, rtol=2e-2)
    assert jnp.allclose(out_noattn, ref_out, atol=2e-2, rtol=2e-2)
    assert jnp.allclose(attn, ref_attn, atol=2e-2, rtol=2e-2)

    print("KERNEL_OK")
</pallas_src>

<mosaic_0001>
module attributes {stable_mosaic.version = 11 : i64} {
  func.func @kernel(%arg0: i32, %arg1: memref<1x8x32xf32, #tpu.memory_space<vmem>>, %arg2: memref<1x8x8xi32, #tpu.memory_space<vmem>>, %arg3: memref<32x192xbf16, #tpu.memory_space<vmem>>, %arg4: memref<64x32xbf16, #tpu.memory_space<vmem>>, %arg5: memref<1x32xf32, #tpu.memory_space<vmem>>, %arg6: memref<1x8x32xf32, #tpu.memory_space<vmem>>, %arg7: memref<1x4x8x8xf32, #tpu.memory_space<vmem>>) attributes {dimension_semantics = [#tpu.dimension_semantics<parallel>], iteration_bounds = array<i64: 2>, scalar_prefetch = 0 : i64, scratch_operands = 0 : i64, tpu.core_type = #tpu.core_type<tc>, window_params = [{transform_indices = @transform_0, window_bounds = array<i64: 1, 8, 32>}, {transform_indices = @transform_1, window_bounds = array<i64: 1, 8, 8>}, {pipeline_mode = #tpu.pipeline_mode<synchronous>, transform_indices = @transform_2, window_bounds = array<i64: 32, 192>}, {pipeline_mode = #tpu.pipeline_mode<synchronous>, transform_indices = @transform_3, window_bounds = array<i64: 64, 32>}, {pipeline_mode = #tpu.pipeline_mode<synchronous>, transform_indices = @transform_4, window_bounds = array<i64: 1, 32>}, {transform_indices = @transform_5, window_bounds = array<i64: 1, 8, 32>}, {transform_indices = @transform_6, window_bounds = array<i64: 1, 4, 8, 8>}]} {
    %c0 = arith.constant 0 : index
    %c0_0 = arith.constant 0 : index
    %c0_1 = arith.constant 0 : index
    %0 = vector.load %arg1[%c0, %c0_0, %c0_1] : memref<1x8x32xf32, #tpu.memory_space<vmem>>, vector<1x8x32xf32>
    %1 = vector.shape_cast %0 : vector<1x8x32xf32> to vector<8x32xf32>
    %2 = arith.truncf %1 : vector<8x32xf32> to vector<8x32xbf16>
    %c0_2 = arith.constant 0 : index
    %c0_3 = arith.constant 0 : index
    %3 = vector.load %arg3[%c0_2, %c0_3] : memref<32x192xbf16, #tpu.memory_space<vmem>>, vector<32x192xbf16>
    %cst = arith.constant dense<0.000000e+00> : vector<8x192xf32>
    %4 = tpu.matmul %2, %3, %cst {dimension_numbers = #tpu.dot_dimension_numbers<[1], [0], [0], [1], [0, 0, 1, 1], [], []>} : vector<8x32xbf16>, vector<32x192xbf16>, vector<8x192xf32> -> vector<8x192xf32>
    %5 = vector.extract_strided_slice %4 {offsets = [0, 0], sizes = [8, 64], strides = [1, 1]} : vector<8x192xf32> to vector<8x64xf32>
    %cst_4 = arith.constant 2.500000e-01 : f32
    %6 = vector.broadcast %cst_4 : f32 to vector<8x64xf32>
    %7 = arith.mulf %5, %6 : vector<8x64xf32>
    %8 = arith.truncf %7 : vector<8x64xf32> to vector<8x64xbf16>
    %9 = vector.extract_strided_slice %4 {offsets = [0, 64], sizes = [8, 64], strides = [1, 1]} : vector<8x192xf32> to vector<8x64xf32>
    %10 = arith.truncf %9 : vector<8x64xf32> to vector<8x64xbf16>
    %11 = vector.extract_strided_slice %4 {offsets = [0, 128], sizes = [8, 64], strides = [1, 1]} : vector<8x192xf32> to vector<8x64xf32>
    %12 = arith.truncf %11 : vector<8x64xf32> to vector<8x64xbf16>
    %c0_5 = arith.constant 0 : index
    %c0_6 = arith.constant 0 : index
    %c0_7 = arith.constant 0 : index
    %13 = vector.load %arg2[%c0_5, %c0_6, %c0_7] : memref<1x8x8xi32, #tpu.memory_space<vmem>>, vector<1x8x8xi32>
    %14 = vector.shape_cast %13 : vector<1x8x8xi32> to vector<8x8xi32>
    %c0_i32 = arith.constant 0 : i32
    %15 = vector.broadcast %c0_i32 : i32 to vector<8x8xi32>
    %16 = arith.cmpi eq, %14, %15 : vector<8x8xi32>
    %17 = vector.extract_strided_slice %8 {offsets = [0, 0], sizes = [8, 16], strides = [1, 1]} : vector<8x64xbf16> to vector<8x16xbf16>
    %18 = vector.extract_strided_slice %10 {offsets = [0, 0], sizes = [8, 16], strides = [1, 1]} : vector<8x64xbf16> to vector<8x16xbf16>
    %19 = vector.extract_strided_slice %12 {offsets = [0, 0], sizes = [8, 16], strides = [1, 1]} : vector<8x64xbf16> to vector<8x16xbf16>
    %cst_8 = arith.constant dense<0.000000e+00> : vector<8x8xf32>
    %20 = tpu.matmul %17, %18, %cst_8 {dimension_numbers = #tpu.dot_dimension_numbers<[1], [1], [0], [0], [0, 0, 1, 0], [], []>} : vector<8x16xbf16>, vector<8x16xbf16>, vector<8x8xf32> -> vector<8x8xf32>
    %cst_9 = arith.constant 0xFF800000 : f32
    %21 = vector.broadcast %cst_9 : f32 to vector<8x8xf32>
    %22 = arith.select %16, %21, %20 : vector<8x8xi1>, vector<8x8xf32>
    %cst_10 = arith.constant dense<0xFF800000> : vector<8xf32>
    %23 = vector.multi_reduction <maximumf>, %22, %cst_10 [1] : vector<8x8xf32> to vector<8xf32>
    %24 = vector.shape_cast %23 : vector<8xf32> to vector<8x1xf32>
    %25 = vector.broadcast %24 : vector<8x1xf32> to vector<8x8xf32>
    %26 = arith.subf %22, %25 : vector<8x8xf32>
    %27 = math.exp %26 : vector<8x8xf32>
    %cst_11 = arith.constant dense<0.000000e+00> : vector<8xf32>
    %28 = vector.multi_reduction <add>, %27, %cst_11 [1] : vector<8x8xf32> to vector<8xf32>
    %29 = vector.shape_cast %28 : vector<8xf32> to vector<8x1xf32>
    %30 = tpu.reciprocal %29 {approx = true} : vector<8x1xf32> -> vector<8x1xf32>
    %31 = vector.broadcast %30 : vector<8x1xf32> to vector<8x8xf32>
    %32 = arith.mulf %27, %31 : vector<8x8xf32>
    %c0_12 = arith.constant 0 : index
    %c0_13 = arith.constant 0 : index
    %c0_14 = arith.constant 0 : index
    %c0_15 = arith.constant 0 : index
    %33 = vector.load %arg7[%c0_12, %c0_13, %c0_14, %c0_15] : memref<1x4x8x8xf32, #tpu.memory_space<vmem>>, vector<1x1x8x8xf32>
    %34 = vector.shape_cast %33 : vector<1x1x8x8xf32> to vector<8x8xf32>
    %35 = vector.shape_cast %32 : vector<8x8xf32> to vector<1x1x8x8xf32>
    tpu.vector_store %arg7[%c0_12, %c0_13, %c0_14, %c0_15], %35 {strides = array<i32>} : memref<1x4x8x8xf32, #tpu.memory_space<vmem>>, vector<1x1x8x8xf32>,
    %36 = arith.truncf %32 : vector<8x8xf32> to vector<8x8xbf16>
    %cst_16 = arith.constant dense<0.000000e+00> : vector<8x16xf32>
    %37 = tpu.matmul %36, %19, %cst_16 {dimension_numbers = #tpu.dot_dimension_numbers<[1], [0], [0], [1], [0, 0, 1, 1], [], []>} : vector<8x8xbf16>, vector<8x16xbf16>, vector<8x16xf32> -> vector<8x16xf32>
    %38 = vector.extract_strided_slice %8 {offsets = [0, 16], sizes = [8, 16], strides = [1, 1]} : vector<8x64xbf16> to vector<8x16xbf16>
    %39 = vector.extract_strided_slice %10 {offsets = [0, 16], sizes = [8, 16], strides = [1, 1]} : vector<8x64xbf16> to vector<8x16xbf16>
    %40 = vector.extract_strided_slice %12 {offsets = [0, 16], sizes = [8, 16], strides = [1, 1]} : vector<8x64xbf16> to vector<8x16xbf16>
    %cst_17 = arith.constant dense<0.000000e+00> : vector<8x8xf32>
    %41 = tpu.matmul %38, %39, %cst_17 {dimension_numbers = #tpu.dot_dimension_numbers<[1], [1], [0], [0], [0, 0, 1, 0], [], []>} : vector<8x16xbf16>, vector<8x16xbf16>, vector<8x8xf32> -> vector<8x8xf32>
    %cst_18 = arith.constant 0xFF800000 : f32
    %42 = vector.broadcast %cst_18 : f32 to vector<8x8xf32>
    %43 = arith.select %16, %42, %41 : vector<8x8xi1>, vector<8x8xf32>
    %cst_19 = arith.constant dense<0xFF800000> : vector<8xf32>
    %44 = vector.multi_reduction <maximumf>, %43, %cst_19 [1] : vector<8x8xf32> to vector<8xf32>
    %45 = vector.shape_cast %44 : vector<8xf32> to vector<8x1xf32>
    %46 = vector.broadcast %45 : vector<8x1xf32> to vector<8x8xf32>
    %47 = arith.subf %43, %46 : vector<8x8xf32>
    %48 = math.exp %47 : vector<8x8xf32>
    %cst_20 = arith.constant dense<0.000000e+00> : vector<8xf32>
    %49 = vector.multi_reduction <add>, %48, %cst_20 [1] : vector<8x8xf32> to vector<8xf32>
    %50 = vector.shape_cast %49 : vector<8xf32> to vector<8x1xf32>
    %51 = tpu.reciprocal %50 {approx = true} : vector<8x1xf32> -> vector<8x1xf32>
    %52 = vector.broadcast %51 : vector<8x1xf32> to vector<8x8xf32>
    %53 = arith.mulf %48, %52 : vector<8x8xf32>
    %c0_21 = arith.constant 0 : index
    %c1 = arith.constant 1 : index
    %c0_22 = arith.constant 0 : index
    %c0_23 = arith.constant 0 : index
    %54 = vector.load %arg7[%c0_21, %c1, %c0_22, %c0_23] : memref<1x4x8x8xf32, #tpu.memory_space<vmem>>, vector<1x1x8x8xf32>
    %55 = vector.shape_cast %54 : vector<1x1x8x8xf32> to vector<8x8xf32>
    %56 = vector.shape_cast %53 : vector<8x8xf32> to vector<1x1x8x8xf32>
    tpu.vector_store %arg7[%c0_21, %c1, %c0_22, %c0_23], %56 {strides = array<i32>} : memref<1x4x8x8xf32, #tpu.memory_space<vmem>>, vector<1x1x8x8xf32>,
    %57 = arith.truncf %53 : vector<8x8xf32> to vector<8x8xbf16>
    %cst_24 = arith.constant dense<0.000000e+00> : vector<8x16xf32>
    %58 = tpu.matmul %57, %40, %cst_24 {dimension_numbers = #tpu.dot_dimension_numbers<[1], [0], [0], [1], [0, 0, 1, 1], [], []>} : vector<8x8xbf16>, vector<8x16xbf16>, vector<8x16xf32> -> vector<8x16xf32>
    %59 = vector.extract_strided_slice %8 {offsets = [0, 32], sizes = [8, 16], strides = [1, 1]} : vector<8x64xbf16> to vector<8x16xbf16>
    %60 = vector.extract_strided_slice %10 {offsets = [0, 32], sizes = [8, 16], strides = [1, 1]} : vector<8x64xbf16> to vector<8x16xbf16>
    %61 = vector.extract_strided_slice %12 {offsets = [0, 32], sizes = [8, 16], strides = [1, 1]} : vector<8x64xbf16> to vector<8x16xbf16>
    %cst_25 = arith.constant dense<0.000000e+00> : vector<8x8xf32>
    %62 = tpu.matmul %59, %60, %cst_25 {dimension_numbers = #tpu.dot_dimension_numbers<[1], [1], [0], [0], [0, 0, 1, 0], [], []>} : vector<8x16xbf16>, vector<8x16xbf16>, vector<8x8xf32> -> vector<8x8xf32>
    %cst_26 = arith.constant 0xFF800000 : f32
    %63 = vector.broadcast %cst_26 : f32 to vector<8x8xf32>
    %64 = arith.select %16, %63, %62 : vector<8x8xi1>, vector<8x8xf32>
    %cst_27 = arith.constant dense<0xFF800000> : vector<8xf32>
    %65 = vector.multi_reduction <maximumf>, %64, %cst_27 [1] : vector<8x8xf32> to vector<8xf32>
    %66 = vector.shape_cast %65 : vector<8xf32> to vector<8x1xf32>
    %67 = vector.broadcast %66 : vector<8x1xf32> to vector<8x8xf32>
    %68 = arith.subf %64, %67 : vector<8x8xf32>
    %69 = math.exp %68 : vector<8x8xf32>
    %cst_28 = arith.constant dense<0.000000e+00> : vector<8xf32>
    %70 = vector.multi_reduction <add>, %69, %cst_28 [1] : vector<8x8xf32> to vector<8xf32>
    %71 = vector.shape_cast %70 : vector<8xf32> to vector<8x1xf32>
    %72 = tpu.reciprocal %71 {approx = true} : vector<8x1xf32> -> vector<8x1xf32>
    %73 = vector.broadcast %72 : vector<8x1xf32> to vector<8x8xf32>
    %74 = arith.mulf %69, %73 : vector<8x8xf32>
    %c0_29 = arith.constant 0 : index
    %c2 = arith.constant 2 : index
    %c0_30 = arith.constant 0 : index
    %c0_31 = arith.constant 0 : index
    %75 = vector.load %arg7[%c0_29, %c2, %c0_30, %c0_31] : memref<1x4x8x8xf32, #tpu.memory_space<vmem>>, vector<1x1x8x8xf32>
    %76 = vector.shape_cast %75 : vector<1x1x8x8xf32> to vector<8x8xf32>
    %77 = vector.shape_cast %74 : vector<8x8xf32> to vector<1x1x8x8xf32>
    tpu.vector_store %arg7[%c0_29, %c2, %c0_30, %c0_31], %77 {strides = array<i32>} : memref<1x4x8x8xf32, #tpu.memory_space<vmem>>, vector<1x1x8x8xf32>,
    %78 = arith.truncf %74 : vector<8x8xf32> to vector<8x8xbf16>
    %cst_32 = arith.constant dense<0.000000e+00> : vector<8x16xf32>
    %79 = tpu.matmul %78, %61, %cst_32 {dimension_numbers = #tpu.dot_dimension_numbers<[1], [0], [0], [1], [0, 0, 1, 1], [], []>} : vector<8x8xbf16>, vector<8x16xbf16>, vector<8x16xf32> -> vector<8x16xf32>
    %80 = vector.extract_strided_slice %8 {offsets = [0, 48], sizes = [8, 16], strides = [1, 1]} : vector<8x64xbf16> to vector<8x16xbf16>
    %81 = vector.extract_strided_slice %10 {offsets = [0, 48], sizes = [8, 16], strides = [1, 1]} : vector<8x64xbf16> to vector<8x16xbf16>
    %82 = vector.extract_strided_slice %12 {offsets = [0, 48], sizes = [8, 16], strides = [1, 1]} : vector<8x64xbf16> to vector<8x16xbf16>
    %cst_33 = arith.constant dense<0.000000e+00> : vector<8x8xf32>
    %83 = tpu.matmul %80, %81, %cst_33 {dimension_numbers = #tpu.dot_dimension_numbers<[1], [1], [0], [0], [0, 0, 1, 0], [], []>} : vector<8x16xbf16>, vector<8x16xbf16>, vector<8x8xf32> -> vector<8x8xf32>
    %cst_34 = arith.constant 0xFF800000 : f32
    %84 = vector.broadcast %cst_34 : f32 to vector<8x8xf32>
    %85 = arith.select %16, %84, %83 : vector<8x8xi1>, vector<8x8xf32>
    %cst_35 = arith.constant dense<0xFF800000> : vector<8xf32>
    %86 = vector.multi_reduction <maximumf>, %85, %cst_35 [1] : vector<8x8xf32> to vector<8xf32>
    %87 = vector.shape_cast %86 : vector<8xf32> to vector<8x1xf32>
    %88 = vector.broadcast %87 : vector<8x1xf32> to vector<8x8xf32>
    %89 = arith.subf %85, %88 : vector<8x8xf32>
    %90 = math.exp %89 : vector<8x8xf32>
    %cst_36 = arith.constant dense<0.000000e+00> : vector<8xf32>
    %91 = vector.multi_reduction <add>, %90, %cst_36 [1] : vector<8x8xf32> to vector<8xf32>
    %92 = vector.shape_cast %91 : vector<8xf32> to vector<8x1xf32>
    %93 = tpu.reciprocal %92 {approx = true} : vector<8x1xf32> -> vector<8x1xf32>
    %94 = vector.broadcast %93 : vector<8x1xf32> to vector<8x8xf32>
    %95 = arith.mulf %90, %94 : vector<8x8xf32>
    %c0_37 = arith.constant 0 : index
    %c3 = arith.constant 3 : index
    %c0_38 = arith.constant 0 : index
    %c0_39 = arith.constant 0 : index
    %96 = vector.load %arg7[%c0_37, %c3, %c0_38, %c0_39] : memref<1x4x8x8xf32, #tpu.memory_space<vmem>>, vector<1x1x8x8xf32>
    %97 = vector.shape_cast %96 : vector<1x1x8x8xf32> to vector<8x8xf32>
    %98 = vector.shape_cast %95 : vector<8x8xf32> to vector<1x1x8x8xf32>
    tpu.vector_store %arg7[%c0_37, %c3, %c0_38, %c0_39], %98 {strides = array<i32>} : memref<1x4x8x8xf32, #tpu.memory_space<vmem>>, vector<1x1x8x8xf32>,
    %99 = arith.truncf %95 : vector<8x8xf32> to vector<8x8xbf16>
    %cst_40 = arith.constant dense<0.000000e+00> : vector<8x16xf32>
    %100 = tpu.matmul %99, %82, %cst_40 {dimension_numbers = #tpu.dot_dimension_numbers<[1], [0], [0], [1], [0, 0, 1, 1], [], []>} : vector<8x8xbf16>, vector<8x16xbf16>, vector<8x16xf32> -> vector<8x16xf32>
    %101 = tpu.concatenate %37, %58, %79, %100 in 1 : vector<8x16xf32>, vector<8x16xf32>, vector<8x16xf32>, vector<8x16xf32> -> vector<8x64xf32>
    %102 = arith.truncf %101 : vector<8x64xf32> to vector<8x64xbf16>
    %c0_41 = arith.constant 0 : index
    %c0_42 = arith.constant 0 : index
    %103 = vector.load %arg4[%c0_41, %c0_42] : memref<64x32xbf16, #tpu.memory_space<vmem>>, vector<64x32xbf16>
    %cst_43 = arith.constant dense<0.000000e+00> : vector<8x32xf32>
    %104 = tpu.matmul %102, %103, %cst_43 {dimension_numbers = #tpu.dot_dimension_numbers<[1], [0], [0], [1], [0, 0, 1, 1], [], []>} : vector<8x64xbf16>, vector<64x32xbf16>, vector<8x32xf32> -> vector<8x32xf32>
    %c0_44 = arith.constant 0 : index
    %c0_45 = arith.constant 0 : index
    %105 = vector.load %arg5[%c0_44, %c0_45] : memref<1x32xf32, #tpu.memory_space<vmem>>, vector<1x32xf32>
    %106 = vector.broadcast %105 : vector<1x32xf32> to vector<8x32xf32>
    %107 = arith.addf %104, %106 : vector<8x32xf32>
    %c0_46 = arith.constant 0 : index
    %c0_47 = arith.constant 0 : index
    %c0_48 = arith.constant 0 : index
    %108 = vector.load %arg6[%c0_46, %c0_47, %c0_48] : memref<1x8x32xf32, #tpu.memory_space<vmem>>, vector<1x8x32xf32>
    %109 = vector.shape_cast %108 : vector<1x8x32xf32> to vector<8x32xf32>
    %110 = vector.shape_cast %107 : vector<8x32xf32> to vector<1x8x32xf32>
    tpu.vector_store %arg6[%c0_46, %c0_47, %c0_48], %110 {strides = array<i32>} : memref<1x8x32xf32, #tpu.memory_space<vmem>>, vector<1x8x32xf32>,
    return
  }
  func.func @transform_0(%arg0: i32) -> (i32, i32, i32) {
    %c0_i32 = arith.constant 0 : i32
    %c0_i32_0 = arith.constant 0 : i32
    %c0_i32_1 = arith.constant 0 : i32
    return %arg0, %c0_i32, %c0_i32_0 : i32, i32, i32
  }
  func.func @transform_1(%arg0: i32) -> (i32, i32, i32) {
    %c0_i32 = arith.constant 0 : i32
    %c0_i32_0 = arith.constant 0 : i32
    %c0_i32_1 = arith.constant 0 : i32
    return %arg0, %c0_i32, %c0_i32_0 : i32, i32, i32
  }
  func.func @transform_2(%arg0: i32) -> (i32, i32) {
    %c0_i32 = arith.constant 0 : i32
    %c0_i32_0 = arith.constant 0 : i32
    %c0_i32_1 = arith.constant 0 : i32
    return %c0_i32, %c0_i32_0 : i32, i32
  }
  func.func @transform_3(%arg0: i32) -> (i32, i32) {
    %c0_i32 = arith.constant 0 : i32
    %c0_i32_0 = arith.constant 0 : i32
    %c0_i32_1 = arith.constant 0 : i32
    return %c0_i32, %c0_i32_0 : i32, i32
  }
  func.func @transform_4(%arg0: i32) -> (i32, i32) {
    %c0_i32 = arith.constant 0 : i32
    %c0_i32_0 = arith.constant 0 : i32
    %c0_i32_1 = arith.constant 0 : i32
    return %c0_i32, %c0_i32_0 : i32, i32
  }
  func.func @transform_5(%arg0: i32) -> (i32, i32, i32) {
    %c0_i32 = arith.constant 0 : i32
    %c0_i32_0 = arith.constant 0 : i32
    %c0_i32_1 = arith.constant 0 : i32
    return %arg0, %c0_i32, %c0_i32_0 : i32, i32, i32
  }
  func.func @transform_6(%arg0: i32) -> (i32, i32, i32, i32) {
    %c0_i32 = arith.constant 0 : i32
    %c0_i32_0 = arith.constant 0 : i32
    %c0_i32_1 = arith.constant 0 : i32
    %c0_i32_2 = arith.constant 0 : i32
    return %arg0, %c0_i32, %c0_i32_0, %c0_i32_1 : i32, i32, i32, i32
  }
}

</mosaic_0001>

<bundles_post_ra>
// kernel: tpu_custom_call.1
= control target key start
LH: loop header
LB: loop body
LE: loop exit
PB: predicated region body
PF: predicated region fallthrough
CT: control target
= control target key end

     0   :  { %12 = vsyncpa [#allocation3], 0  ;;  %s1790_s0 = inlined_call_operand.vmem [shape: f32[2,8,32], index: 0, kind: input, shape index: {}]   ;;  %s1791_s1 = inlined_call_operand.hbm [shape: s32[2,8,8], index: 1, kind: input, shape index: {}]   ;;  %s1792_s2 = inlined_call_operand.vmem [shape: bf16[32,192], index: 2, kind: input, shape index: {}]   ;;  %s1793_s3 = inlined_call_operand.vmem [shape: bf16[64,32], index: 3, kind: input, shape index: {}]   ;;  %s1794_s4 = inlined_call_operand.vmem [shape: f32[1,32], index: 4, kind: input, shape index: {}]   ;;  %s1795_s5 = inlined_call_operand.hbm [shape: f32[2,8,32], index: 5, kind: output, shape index: {0}]   ;;  %s1796_s6 = inlined_call_operand.hbm [shape: f32[2,4,8,8], index: 6, kind: output, shape index: {1}]  }
   0x1   :  { %14 = vsyncpa [#allocation3 + $0x1], 0 }
   0x2   :  { %15 = vsyncpa [#allocation4], 0 }
   0x3   :  { %17 = vsyncpa [#allocation4 + $0x1], 0 }
   0x4   :  { %18 = vsyncpa [#allocation7], 0 }
   0x5   :  { %20 = vsyncpa [#allocation7 + $0x1], 0  ;;  %s1466_s21 = smov 0   ;;  %s1468_s22 = smov 0  }
   0x6   :  { %s1470_s23 = smov 0   ;;  %s1472_s24 = smov 0  }
   0x7 LB: > { %s1487_s25 = sadd.s32 4294967295, %s1414_s24   ;;  %s1076_s26 = sadd.s32 4294967294, %s1414_s24   ;;  %s1414_s24 = sphi %s1472_s24, %s1813_s24   ;;  %s1410_s23 = sphi %s1470_s23, %s1812_s23   ;;  %s1406_s22 = sphi %s1468_s22, %s1811_s22   ;;  %s1402_s21 = sphi %s1466_s21, %s1810_s21  }
   0x8   : > { %s1491_s27 = sadd.s32 1, %s1414_s24   ;;  %s59_s28 = sadd.s32 1, %s1410_s23 }
   0x9   : > { %s56_s29 = ssub.s32 %s1414_s24, %s1491_s27  ;;  %p66_p0 = scmp.ne.s32.totalorder %s1410_s23, %s1406_s22 }
   0xa   : > { %p57_p1 = scmp.eq.s32.totalorder %s56_s29, 0  ;;  %p67_p2 = scmp.eq.s32.totalorder %s1414_s24, 0 }
   0xb   : > { %p72_p3 = scmp.ne.s32.totalorder %s1406_s22, %s1402_s21  ;;  %p73_p4 = scmp.eq.s32.totalorder %s1487_s25, 0 }
   0xc   : > { %s1503_s30 = scalar_select %p57_p1, %s1410_s23, %s59_s28  }
   0xd   : > { %p1505_p5 = por %p67_p2, %p66_p0  ;;  %p1509_p6 = por %p73_p4, %p72_p3 }
   0xe   : > { %p159_p7 = scmp.eq.s32.totalorder %s1487_s25, 1  ;;  %p165_p8 = scmp.eq.s32.totalorder %s1076_s26, 1 }
   0xf   : > { %p1214_p10 = scmp.lt.s32.totalorder %s1414_s24, 2  ;;  %s227_s11 = sand.u32 1, %s1410_s23  }
  0x10   : > { %p1516_p11 = por %p159_p7, %p66_p0  ;;  %p1520_p12 = por %p165_p8, %p72_p3 }
  0x11   : > { %s1080_s12 = sshll.u32 %s1414_s24, 7  ;;  %s1079_s13 = sshll.u32 %s227_s11, 3 }
  0x12   : > { %s1801_s9 = scalar_select %p1516_p11, 1, 0 }
  0x13   : > { %s1802_s10 = scalar_select %p1520_p12, 1, 0 }
  0x14   : > { %s1529_s16 = scalar_lea.hbm %s1791_s1, %s1080_s12  ;;  %s231_s17 = scalar_lea.vmem [#allocation2], %s1079_s13 }
  0x15   : > { %s238_s18 = sshll.u32 %s231_s17, 4  ;;  %p1533_p13 = pnand %p1214_p10, %p1505_p5  ;;  %s1537_s18 = int_to_ptr.vmem [resolvable:$true] %s238_s18 }
  0x16   : > { %s228_s20 = scalar_lea.sflag [#allocation3], %s227_s11  ;;  %s1286_s26 = scalar_lea.hbm %s1529_s16, 128 }
  0x17   : > { %p1287_p2 = scmp.ne.s32.totalorder %s1529_s16, %s1286_s26  ;;  %p1288_p3 = pneg %p1533_p13 }
  0x18   : > { %s1291_s7 = scalar_lea.hbm %s1791_s1, 256  ;;  %p1292_p5 = scmp.lt.u32.totalorder %s1529_s16, %s1791_s1 }
  0x19   : > { %p1289_p4 = pnand %p1288_p3, %p1287_p2  ;;  %p1293_p8 = scmp.lt.u32.totalorder %s1291_s7, %s1286_s26 }
  0x1a   : > { %p1295_p9 = scmp.lt.u32.totalorder %s1286_s26, %s1529_s16 }
  0x1b   : > { %p1290_p7 = pneg %p1289_p4  ;;  %p1294_p10 = por %p1293_p8, %p1292_p5 }
  0x1d   : > { %p1296_p0 = por %p1295_p9, %p1294_p10 }
  0x1f   : > { %p1297_p1 = pnand %p1296_p0, %p1290_p7 }
  0x21   : > { %1300 = shalt.err (!%p1297_p1)
}
  0x22   : > { %s1301_s11 = scalar_lea.vmem %s1537_s18, 128  ;;  %s1416_s14 = smov [#allocation2]  }
  0x23   : > { %p1302_p2 = scmp.ne.s32.totalorder %s1537_s18, %s1301_s11  ;;  %s1306_s15 = sshll.u32 %s1416_s14, 4  ;;  %s1307_s15 = int_to_ptr.vmem [resolvable:$false] %s1306_s15 }
  0x24   : > { %s1308_s17 = scalar_lea.vmem %s1307_s15, 256  ;;  %p1309_p11 = scmp.lt.s32.totalorder %s1537_s18, %s1307_s15 }
  0x25   : > { %p1304_p4 = pnand %p1302_p2, %p1288_p3  ;;  %p1310_p5 = scmp.lt.s32.totalorder %s1308_s17, %s1301_s11 }
  0x27   : > { %p1305_p12 = pneg %p1304_p4  ;;  %p1311_p8 = por %p1310_p5, %p1309_p11 }
  0x29   : > { %p1312_p9 = pnand %p1311_p8, %p1305_p12 }
  0x2b   : > { %1315 = shalt.err (!%p1312_p9)
}
  0x2c   : > { %1206 = dma.hbm_to_vmem [thread:$0]  (!%p1533_p13), %s1529_s16, 128, %s1537_s18, %s228_s20  }
  0x2d   : > { %p1804_p0 = scmp.lt.s32.totalorder %s1414_s24, 3  ;;  %p1805_p1 = scmp.ge.s32.totalorder %s1414_s24, 1 }
  0x2f   : > { %p244_p3 = pnand %p1805_p1, %p1804_p0 }
  0x30   : > { %s1571_s26 = sand.u32 (!%p244_p3), 1, %s1406_s22  }
  0x31   : > { %247 = sbr.rel (%p244_p3) target bundleno = 1551 (0x60f), region = 40  ;;  %s1798_s28 = sshll.u32 (!%p244_p3), %s1571_s26, 3 }
  0x32   : > { %s250_s29 = scalar_lea.sflag (!%p244_p3), [#allocation3], %s1571_s26  ;;  %s1577_s19 = scalar_lea.vmem (!%p244_p3), [#allocation2], %s1798_s28 }
  0x38   : > { %1389 = dma.done.wait (%p1509_p6), %s250_s29, 128  }
  0x39   : > { %1391 = vsyncadd (%p1509_p6), %s250_s29, 4294967168  ;;  %p291_p11 = scmp.lt.s32.totalorder %s1487_s25, 1  ;;  %v1417_v0 = vmov 0   ;;  %v1260_v1 = vld [vmem:[%s1792_s2 + $0x4] ss:$8 sps:$4 sm:$0xff]   ;;  %vm322_vm0 = vcmask 261120  }
  0x3a   : > { %358 = vmatprep.mubr.bf16.mxu0 %v1417_v0  ;;  %v1262_v2 = vld [vmem:[%s1792_s2] ss:$8 sps:$4 sm:$0xff]   ;;  %326 = vmatprep.subr.bf16.mxu0 %v1260_v1  ;;  %v1263_v3 = vld [vmem:[%s1792_s2 + $0x14] ss:$8 sps:$4 sm:$0xff]   ;;  %v1265_v4 = vld [vmem:[%s1792_s2 + $0x10] ss:$8 sps:$4 sm:$0xff]  }
  0x3b   : > { %s292_s16 = scalar_select %p291_p11, %s1487_s25, 1  ;;  %327 = vmatpush1.bf16.msra.mxu0 %v1262_v2  ;;  %v1418_v7 = vmov 0.0   ;;  %vm1419_vm1 = vmmov 0   ;;  %vm441_vm2 = vcmask 1043456   ;;  %vm376_vm3 = vcmask 130048   ;;  %v371_v28 = vld [vmem:[%s1577_s19] sm:$0xff] }
  0x3c   : > { %328 = vmatprep.subr.bf16.mxu0 %v1263_v3  ;;  %1137 = vmatprep.subr.bf16.mxu1 %v1418_v7  ;;  %s1420_s28 = smov 64   ;;  %s1423_s20 = smov 32   ;;  %vm372_vm4 = vcmp.eq.s32.totalorder %v371_v28, 0  ;;  %vm424_vm5 = vcmask 64512   ;;  %vm840_vm6 = vcmask 392192   ;;  %vm882_vm7 = vcmask 523264  }
  0x3d   : > { %s1085_s18 = sshll.u32 %s292_s16, 3  ;;  %1139 = vmatprep.mubr.msk.bf16.mxu1 %vm1419_vm1, %v1418_v7  ;;  %s1421_s16 = smov 112  }
  0x3e   : > { %s294_s12 = scalar_lea.vmem %s1790_s0, %s1085_s18  ;;  %s1422_s18 = smov 48  }
  0x3f   : > { %v296_v5 = vld [vmem:[%s294_s12] sm:$0xff]  ;;  %329 = vmatpush1.bf16.msra.mxu0 %v1265_v4  ;;  %s1424_s7 = smov 96   ;;  %s1425_s12 = smov 16  }
  0x40   : > { %v297_v6 = vpack.c.bf16 %v296_v5, %v296_v5  ;;  %1143 = vmatprep.subr.bf16.mxu0 %v1418_v7  ;;  %s1426_s13 = smov 80   ;;  %s1084_s19 = sshll.u32 %s1571_s26, 5 }
  0x41   : > { %s1658_s11 = scalar_lea.vmem [#allocation6], %s1084_s19  ;;  %s933_s14 = scalar_lea.sflag [#allocation7], %s1571_s26 }
  0x42   : > { %1090 = vmatmul.mubr.msk.bf16.vlgmr.msra.gmra.mrb[0].mxu0 %vm322_vm0, %v297_v6  ;;  %p1806_p12 = scmp.ne.s32.totalorder %s1801_s9, 0  ;;  %s1427_s8 = smov [#allocation6]  }
  0x43   : > { %1145 = vmatprep.mubr.msk.bf16.mxu0 %vm1419_vm1, %v1418_v7  ;;  %s1320_s17 = sshll.u32 %s1427_s8, 4  ;;  %s1321_s17 = int_to_ptr.vmem [resolvable:$false] %s1320_s17 }
 0x115   : > { %v360_v8 = vpop.f32.mrb[0].mxu0 }
 0x116   : > { %v367_v9 = vmul.f32 0.25, %v360_v8  ;;  %v369_v10 = vpack.c.bf16 %v360_v8, %v360_v8  ;;  %v362_v11 = vpop.f32.mrb[1].mxu0 }
 0x117   : > { %v1607_v12 = vpack.c.bf16 %v362_v11, %v362_v11  ;;  %v364_v13 = vpop.f32.mrb[2].mxu0 }
 0x118   : > { %v368_v14 = vpack.c.bf16 %v367_v9, %v367_v9  ;;  %374 = vrot.lane.b32.xlu0 %v369_v10, %s1420_s28  ;;  %v365_v15 = vpop.f32.mrb[3].mxu0 }
 0x119   : > { %v443_v16 = vsel %vm441_vm2, %v1607_v12, 0 }
 0x11a   : > { %486 = vrot.lane.b32.xlu1 %v368_v14, %s1421_s16  ;;  %1144 = vmatpush3.bf16.msra.mxu0 %v443_v16 }
 0x11b   : > { %1155 = vmatprep.subr.bf16.mxu0 %v1418_v7 }
 0x11c   : > { %488 = vrot.lane.b32.xlu0 %v369_v10, %s1422_s18 }
 0x11e   : > { %602 = vrot.lane.b32.xlu1 %v369_v10, %s1423_s20 }
 0x120   : > { %600 = vrot.lane.b32.xlu0 %v368_v14, %s1424_s7 }
 0x122   : > { %715 = vrot.lane.b32.xlu1 %v369_v10, %s1425_s12 }
 0x124   : > { %713 = vrot.lane.b32.xlu0 %v368_v14, %s1426_s13 }
 0x18a   : > { %v375_v17 = vpop.permute.xlu0 %374 }
 0x18b   : > { %v381_v18 = vsel %vm376_vm3, %v375_v17, 0 }
 0x18c   : > { %1138 = vmatpush3.bf16.xpose.msra.mxu1 %v381_v18  ;;  %v487_v20 = vpop.permute.xlu1 %486 }
 0x18d   : > { %1149 = vmatprep.subr.bf16.mxu1 %v1418_v7 }
 0x18e   : > { %v489_v19 = vpop.permute.xlu0 %488 }
 0x18f   : > { %v494_v21 = vsel %vm376_vm3, %v489_v19, 0 }
 0x190   : > { %v603_v22 = vpop.permute.xlu1 %602 }
 0x191   : > { %v608_v23 = vsel %vm376_vm3, %v603_v22, 0 }
 0x192   : > { %v601_v25 = vpop.permute.xlu0 %600 }
 0x193   : > { %1140 = vmatmul.mubr.msk.bf16.vlgmr.msra.gmra.mrb[0].mxu1 %vm376_vm3, %v368_v14 }
 0x194   : > { %1150 = vmatpush3.bf16.xpose.msra.mxu1 %v494_v21  ;;  %1151 = vmatprep.mubr.msk.bf16.mxu1 %vm1419_vm1, %v1418_v7  ;;  %v716_v24 = vpop.permute.xlu1 %715 }
 0x195   : > { %1161 = vmatprep.subr.bf16.mxu1 %v1418_v7  ;;  %v721_v26 = vsel %vm376_vm3, %v716_v24, 0 }
 0x196   : > { %v714_v27 = vpop.permute.xlu0 %713 }
 0x19b   : > { %1152 = vmatmul.mubr.msk.bf16.vlgmr.msra.gmra.mrb[4].mxu1 %vm376_vm3, %v487_v20 }
 0x19c   : > { %1162 = vmatpush3.bf16.xpose.msra.mxu1 %v608_v23  ;;  %1163 = vmatprep.mubr.msk.bf16.mxu1 %vm1419_vm1, %v1418_v7 }
 0x19d   : > { %1173 = vmatprep.subr.bf16.mxu1 %v1418_v7 }
 0x1a3   : > { %1164 = vmatmul.mubr.msk.bf16.vlgmr.msra.gmra.mrb[8].mxu1 %vm376_vm3, %v601_v25 }
 0x1a4   : > { %1174 = vmatpush3.bf16.xpose.msra.mxu1 %v721_v26  ;;  %1175 = vmatprep.mubr.msk.bf16.mxu1 %vm1419_vm1, %v1418_v7 }
 0x1a5   : > { %1185 = vmatprep.subr.bf16.mxu1 %v1418_v7 }
 0x1ab   : > { %1176 = vmatmul.mubr.msk.bf16.vlgmr.msra.gmra.mrb[12].mxu1 %vm376_vm3, %v714_v27 }
 0x1ac   : > { %1193 = vmatprep.mubr.msk.bf16.mxu1 %vm1419_vm1, %v1418_v7 }
 0x266   : > { %v417_v29 = vpop.f32.mrb[0].mxu1 }
 0x267   : > { %v423_v30 = vsel %vm372_vm4, -inf, %v417_v29  ;;  %v1141_v31 = vpop.f32.mrb[1].mxu1 }
 0x268   : > { %v420_v32 = vpop.f32.mrb[2].mxu1  ;;  %v425_v33 = vsel %vm424_vm5, %v423_v30, -inf }
 0x269   : > { %426 = vmax.xlane.f32.xlu1 %v425_v33  ;;  %v1142_v34 = vpop.f32.mrb[3].mxu1 }
 0x26e   : > { %v530_v35 = vpop.f32.mrb[4].mxu1 }
 0x26f   : > { %v536_v36 = vsel %vm372_vm4, -inf, %v530_v35  ;;  %v1153_v37 = vpop.f32.mrb[5].mxu1 }
 0x270   : > { %v533_v38 = vpop.f32.mrb[6].mxu1  ;;  %v537_v39 = vsel %vm424_vm5, %v536_v36, -inf  ;;  %v1267_v37 = vld [vmem:[%s1793_s3 + $0x8] sm:$0xff]  }
 0x271   : > { %538 = vmax.xlane.f32.xlu0 %v537_v39  ;;  %v1154_v40 = vpop.f32.mrb[7].mxu1 }
 0x276   : > { %v644_v41 = vpop.f32.mrb[8].mxu1 }
 0x277   : > { %v650_v42 = vsel %vm372_vm4, -inf, %v644_v41  ;;  %v1165_v43 = vpop.f32.mrb[9].mxu1  ;;  %v1268_v41 = vld [vmem:[%s1793_s3 + $0x10] sm:$0xff]  }
 0x278   : > { %v647_v44 = vpop.f32.mrb[10].mxu1  ;;  %v651_v45 = vsel %vm424_vm5, %v650_v42, -inf }
 0x279   : > { %652 = vmax.xlane.f32.xlu0 %v651_v45  ;;  %v1166_v46 = vpop.f32.mrb[11].mxu1 }
 0x27e   : > { %v757_v47 = vpop.f32.mrb[12].mxu1 }
 0x27f   : > { %v763_v48 = vsel %vm372_vm4, -inf, %v757_v47  ;;  %v1177_v49 = vpop.f32.mrb[13].mxu1  ;;  %v1269_v47 = vld [vmem:[%s1793_s3 + $0x18] sm:$0xff]  }
 0x280   : > { %v760_v50 = vpop.f32.mrb[14].mxu1  ;;  %v764_v51 = vsel %vm424_vm5, %v763_v48, -inf }
 0x281   : > { %765 = vmax.xlane.f32.xlu1 %v764_v51  ;;  %v1178_v52 = vpop.f32.mrb[15].mxu1 }
 0x2f6   : > { %v427_v53 = vpop.xlane.xlu1 %426 }
 0x2f7   : > { %v428_v54 = vsub.f32 %v423_v30, %v427_v53 }
 0x2f9   : > { %v429_v55 = vmul.f32 1.442695, %v428_v54 }
 0x2fb   : > { %1270 = vpow2.f32 %v429_v55 }
 0x2fe   : > { %v539_v56 = vpop.xlane.xlu0 %538 }
 0x2ff   : > { %v540_v57 = vsub.f32 %v536_v36, %v539_v56  ;;  %v1266_v36 = vld [vmem:[%s1793_s3] sm:$0xff]  }
 0x300   : > { %1186 = vmatpush3.bf16.msra.mxu1 %v1266_v36 }
 0x301   : > { %v541_v58 = vmul.f32 1.442695, %v540_v57  ;;  %1187 = vmatprep.subr.bf16.mxu1 %v1418_v7 }
 0x303   : > { %1272 = vpow2.f32 %v541_v58 }
 0x304   : > { %1188 = vmatpush3.bf16.msra.mxu1 %v1267_v37 }
 0x305   : > { %v1271_v59 = vpop.eup %1270  ;;  %1189 = vmatprep.subr.bf16.mxu1 %v1418_v7 }
 0x306   : > { %v653_v60 = vpop.xlane.xlu0 %652  ;;  %v431_v61 = vsel %vm424_vm5, %v1271_v59, 0.0 }
 0x307   : > { %v654_v62 = vsub.f32 %v650_v42, %v653_v60  ;;  %432 = vadd.xlane.f32.xlu0 %v431_v61 }
 0x308   : > { %1190 = vmatpush3.bf16.msra.mxu1 %v1268_v41 }
 0x309   : > { %v655_v63 = vmul.f32 1.442695, %v654_v62  ;;  %1191 = vmatprep.subr.bf16.mxu1 %v1418_v7 }
 0x30b   : > { %1274 = vpow2.f32 %v655_v63 }
 0x30c   : > { %1192 = vmatpush3.bf16.msra.mxu1 %v1269_v47 }
 0x30d   : > { %v1273_v0 = vpop.eup %1272 }
 0x30e   : > { %v543_v1 = vsel %vm424_vm5, %v1273_v0, 0.0  ;;  %v766_v4 = vpop.xlane.xlu1 %765 }
 0x30f   : > { %544 = vadd.xlane.f32.xlu1 %v543_v1  ;;  %v767_v5 = vsub.f32 %v763_v48, %v766_v4 }
 0x311   : > { %v768_v6 = vmul.f32 1.442695, %v767_v5 }
 0x313   : > { %1276 = vpow2.f32 %v768_v6 }
 0x315   : > { %v1275_v2 = vpop.eup %1274 }
 0x316   : > { %v657_v3 = vsel %vm424_vm5, %v1275_v2, 0.0 }
 0x317   : > { %658 = vadd.xlane.f32.xlu0 %v657_v3 }
 0x31d   : > { %v1277_v8 = vpop.eup %1276 }
 0x31e   : > { %v770_v9 = vsel %vm424_vm5, %v1277_v8, 0.0 }
 0x320   : > { %665 = vrot.lane.b32.xlu1 %v1607_v12, %s1424_s7 }
 0x32d   : > { %552 = vrot.lane.b32.xlu0 %v1607_v12, %s1421_s16 }
 0x344   : > { %771 = vadd.xlane.f32.xlu1 %v770_v9 }
 0x355   : > { %778 = vrot.lane.b32.xlu1 %v1607_v12, %s1426_s13 }
 0x394   : > { %v433_v10 = vpop.xlane.xlu0 %432 }
 0x395   : > { %1278 = vrcp.f32 %v433_v10 }
 0x39c   : > { %v545_v11 = vpop.xlane.xlu1 %544 }
 0x39d   : > { %1280 = vrcp.f32 %v545_v11 }
 0x39f   : > { %v1279_v13 = vpop.eup %1278 }
 0x3a0   : > { %v435_v14 = vmul.f32 %v1279_v13, %v1271_v59  ;;  %v666_v20 = vpop.permute.xlu1 %665 }
 0x3a1   : > { %v671_v22 = vsel %vm441_vm2, %v666_v20, 0 }
 0x3a2   : > { %436 = vst.msk [vmem:[%s1658_s11] sm:$0xff] %vm424_vm5, %v435_v14  ;;  %v437_v15 = vpack.c.bf16 %v435_v14, %v435_v14 }
 0x3a4   : > { %v659_v16 = vpop.xlane.xlu0 %658  ;;  %1146 = vmatmul.mubr.msk.bf16.vlgmr.msra.gmra.mrb[4].mxu0 %vm424_vm5, %v437_v15 }
 0x3a5   : > { %1282 = vrcp.f32 %v659_v16  ;;  %1157 = vmatprep.mubr.msk.bf16.mxu0 %vm1419_vm1, %v1418_v7 }
 0x3a7   : > { %v1281_v12 = vpop.eup %1280 }
 0x3a8   : > { %v547_v17 = vmul.f32 %v1281_v12, %v1273_v0  ;;  %v553_v18 = vpop.permute.xlu0 %552 }
 0x3a9   : > { %v558_v19 = vsel %vm441_vm2, %v553_v18, 0 }
 0x3aa   : > { %1094 = vst.msk [vmem:[%s1658_s11 + $0x8] sm:$0xff] %vm424_vm5, %v547_v17  ;;  %1156 = vmatpush3.bf16.msra.mxu0 %v558_v19  ;;  %v550_v21 = vpack.c.bf16 %v547_v17, %v547_v17 }
 0x3ab   : > { %1167 = vmatprep.subr.bf16.mxu0 %v1418_v7 }
 0x3ad   : > { %1158 = vmatmul.mubr.msk.bf16.vlgmr.msra.gmra.mrb[8].mxu0 %vm424_vm5, %v550_v21 }
 0x3ae   : > { %1168 = vmatpush3.bf16.msra.mxu0 %v671_v22  ;;  %1169 = vmatprep.mubr.msk.bf16.mxu0 %vm1419_vm1, %v1418_v7 }
 0x3af   : > { %v1283_v23 = vpop.eup %1282  ;;  %1179 = vmatprep.subr.bf16.mxu0 %v1418_v7 }
 0x3b0   : > { %v661_v24 = vmul.f32 %v1283_v23, %v1275_v2 }
 0x3b2   : > { %1097 = vst.msk [vmem:[%s1658_s11 + $0x10] sm:$0xff] %vm424_vm5, %v661_v24  ;;  %v664_v25 = vpack.c.bf16 %v661_v24, %v661_v24 }
 0x3b5   : > { %1170 = vmatmul.mubr.msk.bf16.vlgmr.msra.gmra.mrb[12].mxu0 %vm424_vm5, %v664_v25 }
 0x3b6   : > { %1181 = vmatprep.mubr.msk.bf16.mxu0 %vm1419_vm1, %v1418_v7 }
 0x3d1   : > { %v772_v26 = vpop.xlane.xlu1 %771 }
 0x3d2   : > { %1284 = vrcp.f32 %v772_v26 }
 0x3d5   : > { %v779_v27 = vpop.permute.xlu1 %778 }
 0x3d6   : > { %v784_v28 = vsel %vm441_vm2, %v779_v27, 0 }
 0x3d7   : > { %1180 = vmatpush3.bf16.msra.mxu0 %v784_v28 }
 0x3dc   : > { %v1285_v29 = vpop.eup %1284 }
 0x3dd   : > { %v774_v30 = vmul.f32 %v1285_v29, %v1277_v8 }
 0x3df   : > { %1100 = vst.msk [vmem:[%s1658_s11 + $0x18] sm:$0xff] %vm424_vm5, %v774_v30  ;;  %v777_v31 = vpack.c.bf16 %v774_v30, %v774_v30 }
 0x3e1   : > { %1182 = vmatmul.mubr.msk.bf16.vlgmr.msra.gmra.mrb[16].mxu0 %vm424_vm5, %v777_v31 }
 0x477   : > { %v479_v32 = vpop.f32.mrb[4].mxu0 }
 0x478   : > { %v1147_v33 = vpop.f32.mrb[5].mxu0 }
 0x479   : > { %v482_v34 = vpop.f32.mrb[6].mxu0 }
 0x47a   : > { %v1148_v35 = vpop.f32.mrb[7].mxu0 }
 0x480   : > { %v594_v38 = vpop.f32.mrb[8].mxu0 }
 0x481   : > { %827 = vrot.lane.b32.xlu0 %v594_v38, %s1425_s12  ;;  %v1159_v39 = vpop.f32.mrb[9].mxu0  ;;  %s959_s12 = sshll.u32 %s1658_s11, 4  ;;  %s1322_s11 = scalar_lea.vmem %s1321_s17, 1024  ;;  %s1710_s12 = int_to_ptr.vmem [resolvable:$true] %s959_s12 }
 0x482   : > { %v597_v40 = vpop.f32.mrb[10].mxu0  ;;  %s1316_s15 = scalar_lea.vmem %s1710_s12, 512  ;;  %p1323_p10 = scmp.lt.s32.totalorder %s1710_s12, %s1321_s17 }
 0x483   : > { %v1160_v42 = vpop.f32.mrb[11].mxu0  ;;  %p1317_p6 = scmp.ne.s32.totalorder %s1710_s12, %s1316_s15  ;;  %p1324_p2 = scmp.lt.s32.totalorder %s1322_s11, %s1316_s15 }
 0x485   : > { %p1318_p13 = pnand %p1317_p6, %p1806_p12  ;;  %p1325_p4 = por %p1324_p2, %p1323_p10 }
 0x487   : > { %p1319_p7 = pneg %p1318_p13 }
 0x488   : > { %v707_v43 = vpop.f32.mrb[12].mxu0 }
 0x489   : > { %831 = vrot.lane.b32.xlu1 %v707_v43, %s1423_s20  ;;  %v1171_v44 = vpop.f32.mrb[13].mxu0  ;;  %s1115_s20 = sshll.u32 %s1487_s25, 9  ;;  %p1326_p5 = pnand %p1325_p4, %p1319_p7 }
 0x48a   : > { %v710_v45 = vpop.f32.mrb[14].mxu0  ;;  %s1708_s19 = scalar_lea.hbm %s1796_s6, %s1115_s20 }
 0x48b   : > { %v1172_v46 = vpop.f32.mrb[15].mxu0 }
 0x4b4   : > { %v820_v48 = vpop.f32.mrb[16].mxu0 }
 0x4b5   : > { %835 = vrot.lane.b32.xlu0 %v820_v48, %s1422_s18  ;;  %v1183_v49 = vpop.f32.mrb[17].mxu0 }
 0x4b6   : > { %v823_v50 = vpop.f32.mrb[18].mxu0 }
 0x4b7   : > { %v1184_v7 = vpop.f32.mrb[19].mxu0 }
 0x4f3   : > { %v828_v51 = vpop.permute.xlu0 %827 }
 0x4f4   : > { %v838_v53 = vsel %vm376_vm3, %v479_v32, %v828_v51 }
 0x4fb   : > { %v832_v52 = vpop.permute.xlu1 %831 }
 0x4fc   : > { %v839_v54 = vsel %vm322_vm0, %v838_v53, %v832_v52 }
 0x527   : > { %v836_v55 = vpop.permute.xlu0 %835 }
 0x528   : > { %v841_v56 = vsel %vm840_vm6, %v839_v54, %v836_v55 }
 0x529   : > { %v842_v57 = vpack.c.bf16 %v841_v56, %v841_v56 }
 0x52b   : > { %1194 = vmatmul.mubr.msk.bf16.vlgmr.msra.gmra.mrb[16].mxu1 %vm882_vm7, %v842_v57 }
 0x52c   : > { %1329 = shalt.err (!%p1326_p5)
}
 0x52d   : > { %s1330_s29 = scalar_lea.hbm %s1708_s19, 512  ;;  %s1334_s7 = scalar_lea.hbm %s1796_s6, 1024 }
 0x52e   : > { %p1331_p8 = scmp.ne.s32.totalorder %s1708_s19, %s1330_s29  ;;  %p1335_p1 = scmp.lt.u32.totalorder %s1708_s19, %s1796_s6 }
 0x52f   : > { %p1336_p3 = scmp.lt.u32.totalorder %s1334_s7, %s1330_s29  ;;  %p1338_p6 = scmp.lt.u32.totalorder %s1330_s29, %s1708_s19 }
 0x530   : > { %p1332_p9 = pnand %p1331_p8, %p1806_p12 }
 0x531   : > { %p1337_p11 = por %p1336_p3, %p1335_p1 }
 0x532   : > { %p1333_p0 = pneg %p1332_p9 }
 0x533   : > { %p1339_p13 = por %p1338_p6, %p1337_p11 }
 0x535   : > { %p1340_p7 = pnand %p1339_p13, %p1333_p0 }
 0x537   : > { %1343 = shalt.err (!%p1340_p7)
}
 0x538   : > { %s1428_s13 = smov 128   ;;  %s1429_s15 = smov 8   ;;  %v1102_v58 = vld [vmem:[%s1794_s4] ss:$0 sm:$0xff] }
 0x539   : > { %1200 = dma.vmem_to_hbm [thread:$0]  (%p1806_p12), %s1710_s12, 512, %s1708_s19, %s933_s14, %s1428_s13, %s1428_s13, %s1429_s15  }
 0x53a   : > { %s1110_s11 = sshll.u32 %s1487_s25, 7  ;;  %s1807_s29 = sshll.u32 %s1571_s26, 3 }
 0x53b   : > { %s283_s28 = scalar_lea.vmem [#allocation5], %s1807_s29  ;;  %s1745_s18 = scalar_lea.hbm %s1795_s5, %s1110_s11 }
 0x53c   : > { %s946_s16 = sshll.u32 %s283_s28, 4  ;;  %s928_s25 = scalar_lea.sflag [#allocation4], %s1571_s26  ;;  %s1747_s16 = int_to_ptr.vmem [resolvable:$true] %s946_s16 }
 0x53d   : > { %s1344_s12 = scalar_lea.vmem %s1747_s16, 128  ;;  %s1430_s19 = smov [#allocation5]  }
 0x53e   : > { %p1345_p10 = scmp.ne.s32.totalorder %s1747_s16, %s1344_s12  ;;  %s1348_s14 = sshll.u32 %s1430_s19, 4  ;;  %s1349_s14 = int_to_ptr.vmem [resolvable:$false] %s1348_s14 }
 0x53f   : > { %s1350_s13 = scalar_lea.vmem %s1349_s14, 256  ;;  %p1351_p5 = scmp.lt.s32.totalorder %s1747_s16, %s1349_s14 }
 0x540   : > { %p1346_p2 = pnand %p1345_p10, %p1806_p12  ;;  %p1352_p8 = scmp.lt.s32.totalorder %s1350_s13, %s1344_s12 }
 0x542   : > { %p1347_p4 = pneg %p1346_p2  ;;  %p1353_p9 = por %p1352_p8, %p1351_p5 }
 0x544   : > { %p1354_p0 = pnand %p1353_p9, %p1347_p4 }
 0x5fe   : > { %v920_v59 = vpop.f32.mrb[16].mxu1 }
 0x5ff   : > { %v921_v60 = vadd.f32 %v1102_v58, %v920_v59  ;;  %v1195_v61 = vpop.f32.mrb[17].mxu1 }
 0x600   : > { %v923_v62 = vpop.f32.mrb[18].mxu1 }
 0x601   : > { %v1196_v63 = vpop.f32.mrb[19].mxu1  ;;  %926 = vst.msk [vmem:[%s283_s28] sm:$0xff] %vm322_vm0, %v921_v60 }
 0x602   : > { %1357 = shalt.err (!%p1354_p0)
}
 0x603   : > { %s1358_s26 = scalar_lea.hbm %s1745_s18, 128  ;;  %s1362_s17 = scalar_lea.hbm %s1795_s5, 256 }
 0x604   : > { %p1359_p1 = scmp.ne.s32.totalorder %s1745_s18, %s1358_s26  ;;  %p1363_p6 = scmp.lt.u32.totalorder %s1745_s18, %s1795_s5 }
 0x605   : > { %p1364_p13 = scmp.lt.u32.totalorder %s1362_s17, %s1358_s26  ;;  %p1366_p10 = scmp.lt.u32.totalorder %s1358_s26, %s1745_s18 }
 0x606   : > { %p1360_p3 = pnand %p1359_p1, %p1806_p12 }
 0x607   : > { %p1365_p7 = por %p1364_p13, %p1363_p6 }
 0x608   : > { %p1361_p11 = pneg %p1360_p3 }
 0x609   : > { %p1367_p2 = por %p1366_p10, %p1365_p7 }
 0x60b   : > { %p1368_p4 = pnand %p1367_p2, %p1361_p11 }
 0x60d   : > { %1371 = shalt.err (!%p1368_p4)
}
 0x60e   : > { %1199 = dma.vmem_to_hbm [thread:$0]  (%p1806_p12), %s1747_s16, 128, %s1745_s18, %s928_s25  }
 0x60f PF: > { %s974_s28 = sand.u32 1, %s1402_s21   ;;  %p1808_p5 = scmp.ne.s32.totalorder %s1802_s10, 0 }
 0x610   : > { %p1809_p8 = scmp.ge.s32.totalorder %s1414_s24, 2  ;;  %s975_s7 = scalar_lea.sflag [#allocation4], %s974_s28 }
 0x612   : > { %p1208_p9 = pnand %p1809_p8, %p1808_p5 }
 0x614   : > { %1393 = dma.done.wait (!%p1208_p9), %s975_s7, 128  }
 0x615   : > { %1395 = vsyncadd (!%p1208_p9), %s975_s7, 4294967168  ;;  %s984_s20 = scalar_lea.sflag [#allocation7], %s974_s28 }
 0x616   : > { %1397 = dma.done.wait (!%p1208_p9), %s984_s20, 512  }
 0x617   : > { %1399 = vsyncadd (!%p1208_p9), %s984_s20, 4294966784  ;;  %p23_p12 = scmp.ge.s32.totalorder %s1491_s27, 4   ;;  %s1810_s21 = smov %s1406_s22 }
 0x618   : > { %s1811_s22 = smov %s1410_s23  ;;  %s1812_s23 = smov %s1503_s30 }
 0x619   : > { %s1813_s24 = smov %s1491_s27  ;;  %25 = sbr.rel (!%p23_p12) target bundleno = 7 (0x7), region = 108 }
 0x620   :  { %989 = vsyncpa [#allocation3], 1 }
 0x621   :  { %991 = vsyncpa [#allocation3 + $0x1], 1 }
 0x622   :  { %992 = vsyncpa [#allocation4], 1 }
 0x623   :  { %994 = vsyncpa [#allocation4 + $0x1], 1 }
 0x624   :  { %995 = vsyncpa [#allocation7], 1 }
 0x625   :  { %997 = vsyncpa [#allocation7 + $0x1], 1 }

</bundles_post_ra>
